<compile_context>
chip_gen: v5e
topology: v5e:2x2
jax: 0.10.0
libtpu: 0.0.40
codegen_flags: <defaults>
</compile_context>

<pallas_src>
import jax
import jax.numpy as jnp
from jax.experimental import pallas as pl
from jax.experimental.pallas import tpu as pltpu


# Batch tile: large enough to amortize per-grid-step overhead (~0.35 us) and
# approach the HBM roofline on v6e/v7x; double-buffered f32 x tile ~24.5 MiB.
_TB_MAX = 4096

# Scoped VMEM budget: covers the double-buffered f32 x tile on every generation
# (v5e's default is only 16 MiB) while staying under v7x's 64 MiB physical VMEM.
_VMEM_LIMIT_BYTES = 48 << 20


def _mlp_kernel(x_ref, w1_ref, b1_ref, w2_ref, b2_ref, w3_ref, b3_ref, o_ref):
    # layer 1: Linear(input, 10) + ReLU
    # x arrives f32 (single HBM read); downcast to bf16 here so the MXU takes
    # its fast bf16 path. Accumulation stays f32 via preferred_element_type.
    x_bf16 = x_ref[...].astype(jnp.bfloat16)
    h1 = (
        jnp.dot(x_bf16, w1_ref[...], preferred_element_type=jnp.float32)
        + b1_ref[...]
    )
    h1 = jnp.maximum(h1, 0.0)
    # layer 2: Linear(10, 12) + ReLU  (tiny, kept f32)
    h2 = (
        jnp.dot(h1, w2_ref[...], preferred_element_type=jnp.float32) + b2_ref[...]
    )
    h2 = jnp.maximum(h2, 0.0)
    # layer 3: Linear(12, 10), no activation
    o_ref[...] = (
        jnp.dot(h2, w3_ref[...], preferred_element_type=jnp.float32) + b3_ref[...]
    ).astype(o_ref.dtype)


def mlp_forward(x, params):
    """x: (B, F) float32 array. params: dict of (in,out) weights and (1,out) biases."""
    w1, b1 = params["w1"], params["b1"]
    w2, b2 = params["w2"], params["b2"]
    w3, b3 = params["w3"], params["b3"]

    B, F = x.shape
    out_dim = w3.shape[1]

    # x stays f32 at the pallas_call boundary (no standalone cast pass).
    x = x.astype(jnp.float32)
    # w1 is resident and tiny (784x10); pre-cast to bf16 once for the bf16 MXU path.
    w1_bf16 = w1.astype(jnp.bfloat16)
    b1 = b1.astype(jnp.float32)
    w2 = w2.astype(jnp.float32)
    b2 = b2.astype(jnp.float32)
    w3 = w3.astype(jnp.float32)
    b3 = b3.astype(jnp.float32)

    tb = min(_TB_MAX, B)
    grid = (pl.cdiv(B, tb),)

    # Resident operands: constant block index -> DMA'd once, not per batch tile.
    resident = lambda a: pl.BlockSpec(a.shape, lambda i: (0,) * a.ndim)

    # Advisory cost model: memory-bound on x.
    weight_bytes = (
        w1_bf16.size * 2 + (b1.size + w2.size + b2.size + w3.size + b3.size) * 4
    )
    cost = pl.CostEstimate(
        flops=2 * B * (F * 10 + 10 * 12 + 12 * out_dim),
        transcendentals=0,
        bytes_accessed=B * F * 4 + B * out_dim * 4 + weight_bytes,
    )

    return pl.pallas_call(
        _mlp_kernel,
        out_shape=jax.ShapeDtypeStruct((B, out_dim), jnp.float32),
        grid=grid,
        in_specs=[
            pl.BlockSpec((tb, F), lambda i: (i, 0)),  # x: streamed over batch
            resident(w1_bf16),
            resident(b1),
            resident(w2),
            resident(b2),
            resident(w3),
            resident(b3),
        ],
        out_specs=pl.BlockSpec((tb, out_dim), lambda i: (i, 0)),
        compiler_params=pltpu.CompilerParams(
            dimension_semantics=("parallel",),
            vmem_limit_bytes=_VMEM_LIMIT_BYTES,
        ),
        cost_estimate=cost,
    )(x, w1_bf16, b1, w2, b2, w3, b3)


def init_params(key, input_dim, output_dim):
    """Deterministic init matching the PyTorch module's layer shapes.

    PyTorch nn.Linear(in, out) holds weight (out, in); we store the transpose
    (in, out) so the kernel computes x @ W + b.
    """
    k1, k2, k3, k4, k5, k6 = jax.random.split(key, 6)

    def uniform(k, shape, fan_in):
        bound = 1.0 / jnp.sqrt(fan_in)
        return jax.random.uniform(k, shape, jnp.float32, -bound, bound)

    return {
        "w1": uniform(k1, (input_dim, 10), input_dim),
        "b1": uniform(k2, (1, 10), input_dim),
        "w2": uniform(k3, (10, 12), 10),
        "b2": uniform(k4, (1, 12), 10),
        "w3": uniform(k5, (12, output_dim), 12),
        "b3": uniform(k6, (1, output_dim), 12),
    }


if __name__ == "__main__":
    INPUT = 784   # MNIST flattened image, as implied by the module's usage
    OUTPUT = 10
    BATCH = 8     # small smoke-test batch; kernel tiles up to TB=4096 rows

    key = jax.random.PRNGKey(0)
    kx, kp = jax.random.split(key)
    x = jax.random.normal(kx, (BATCH, INPUT), jnp.float32)
    params = init_params(kp, INPUT, OUTPUT)

    out = mlp_forward(x, params)
    out = jax.block_until_ready(out)

    # Reference in plain JAX, with the same bf16 cast on the first layer so the
    # comparison checks the kernel rather than the quantization choice.
    h = jnp.dot(
        x.astype(jnp.bfloat16),
        params["w1"].astype(jnp.bfloat16),
        preferred_element_type=jnp.float32,
    ) + params["b1"]
    h = jnp.maximum(h, 0.0)
    h = jnp.maximum(h @ params["w2"] + params["b2"], 0.0)
    ref = h @ params["w3"] + params["b3"]

    assert out.shape == (BATCH, OUTPUT)
    assert out.dtype == jnp.float32
    assert jnp.allclose(out, ref, atol=1e-3, rtol=1e-3)

    print("KERNEL_OK")
</pallas_src>

<mosaic_0001>
module attributes {stable_mosaic.version = 11 : i64} {
  func.func @_mlp_kernel(%arg0: i32, %arg1: memref<8x784xf32, #tpu.memory_space<vmem>>, %arg2: memref<784x10xbf16, #tpu.memory_space<vmem>>, %arg3: memref<1x10xf32, #tpu.memory_space<vmem>>, %arg4: memref<10x12xf32, #tpu.memory_space<vmem>>, %arg5: memref<1x12xf32, #tpu.memory_space<vmem>>, %arg6: memref<12x10xf32, #tpu.memory_space<vmem>>, %arg7: memref<1x10xf32, #tpu.memory_space<vmem>>, %arg8: memref<8x10xf32, #tpu.memory_space<vmem>>) attributes {dimension_semantics = [#tpu.dimension_semantics<parallel>], iteration_bounds = array<i64: 1>, scalar_prefetch = 0 : i64, scratch_operands = 0 : i64, tpu.core_type = #tpu.core_type<tc>, window_params = [{transform_indices = @transform_0, window_bounds = array<i64: 8, 784>}, {pipeline_mode = #tpu.pipeline_mode<synchronous>, transform_indices = @transform_1, window_bounds = array<i64: 784, 10>}, {pipeline_mode = #tpu.pipeline_mode<synchronous>, transform_indices = @transform_2, window_bounds = array<i64: 1, 10>}, {pipeline_mode = #tpu.pipeline_mode<synchronous>, transform_indices = @transform_3, window_bounds = array<i64: 10, 12>}, {pipeline_mode = #tpu.pipeline_mode<synchronous>, transform_indices = @transform_4, window_bounds = array<i64: 1, 12>}, {pipeline_mode = #tpu.pipeline_mode<synchronous>, transform_indices = @transform_5, window_bounds = array<i64: 12, 10>}, {pipeline_mode = #tpu.pipeline_mode<synchronous>, transform_indices = @transform_6, window_bounds = array<i64: 1, 10>}, {transform_indices = @transform_7, window_bounds = array<i64: 8, 10>}]} {
    %c0 = arith.constant 0 : index
    %c0_0 = arith.constant 0 : index
    %0 = vector.load %arg1[%c0, %c0_0] : memref<8x784xf32, #tpu.memory_space<vmem>>, vector<8x784xf32>
    %1 = arith.truncf %0 : vector<8x784xf32> to vector<8x784xbf16>
    %c0_1 = arith.constant 0 : index
    %c0_2 = arith.constant 0 : index
    %2 = vector.load %arg2[%c0_1, %c0_2] : memref<784x10xbf16, #tpu.memory_space<vmem>>, vector<784x10xbf16>
    %cst = arith.constant dense<0.000000e+00> : vector<8x10xf32>
    %3 = tpu.matmul %1, %2, %cst {dimension_numbers = #tpu.dot_dimension_numbers<[1], [0], [0], [1], [0, 0, 1, 1], [], []>} : vector<8x784xbf16>, vector<784x10xbf16>, vector<8x10xf32> -> vector<8x10xf32>
    %c0_3 = arith.constant 0 : index
    %c0_4 = arith.constant 0 : index
    %4 = vector.load %arg3[%c0_3, %c0_4] : memref<1x10xf32, #tpu.memory_space<vmem>>, vector<1x10xf32>
    %5 = vector.broadcast %4 : vector<1x10xf32> to vector<8x10xf32>
    %6 = arith.addf %3, %5 : vector<8x10xf32>
    %cst_5 = arith.constant 0.000000e+00 : f32
    %7 = vector.broadcast %cst_5 : f32 to vector<8x10xf32>
    %8 = arith.maximumf %6, %7 : vector<8x10xf32>
    %c0_6 = arith.constant 0 : index
    %c0_7 = arith.constant 0 : index
    %9 = vector.load %arg4[%c0_6, %c0_7] : memref<10x12xf32, #tpu.memory_space<vmem>>, vector<10x12xf32>
    %cst_8 = arith.constant dense<0.000000e+00> : vector<8x12xf32>
    %10 = tpu.matmul %8, %9, %cst_8 {dimension_numbers = #tpu.dot_dimension_numbers<[1], [0], [0], [1], [0, 0, 1, 1], [], []>} : vector<8x10xf32>, vector<10x12xf32>, vector<8x12xf32> -> vector<8x12xf32>
    %c0_9 = arith.constant 0 : index
    %c0_10 = arith.constant 0 : index
    %11 = vector.load %arg5[%c0_9, %c0_10] : memref<1x12xf32, #tpu.memory_space<vmem>>, vector<1x12xf32>
    %12 = vector.broadcast %11 : vector<1x12xf32> to vector<8x12xf32>
    %13 = arith.addf %10, %12 : vector<8x12xf32>
    %cst_11 = arith.constant 0.000000e+00 : f32
    %14 = vector.broadcast %cst_11 : f32 to vector<8x12xf32>
    %15 = arith.maximumf %13, %14 : vector<8x12xf32>
    %c0_12 = arith.constant 0 : index
    %c0_13 = arith.constant 0 : index
    %16 = vector.load %arg6[%c0_12, %c0_13] : memref<12x10xf32, #tpu.memory_space<vmem>>, vector<12x10xf32>
    %cst_14 = arith.constant dense<0.000000e+00> : vector<8x10xf32>
    %17 = tpu.matmul %15, %16, %cst_14 {dimension_numbers = #tpu.dot_dimension_numbers<[1], [0], [0], [1], [0, 0, 1, 1], [], []>} : vector<8x12xf32>, vector<12x10xf32>, vector<8x10xf32> -> vector<8x10xf32>
    %c0_15 = arith.constant 0 : index
    %c0_16 = arith.constant 0 : index
    %18 = vector.load %arg7[%c0_15, %c0_16] : memref<1x10xf32, #tpu.memory_space<vmem>>, vector<1x10xf32>
    %19 = vector.broadcast %18 : vector<1x10xf32> to vector<8x10xf32>
    %20 = arith.addf %17, %19 : vector<8x10xf32>
    %c0_17 = arith.constant 0 : index
    %c0_18 = arith.constant 0 : index
    %21 = vector.load %arg8[%c0_17, %c0_18] : memref<8x10xf32, #tpu.memory_space<vmem>>, vector<8x10xf32>
    tpu.vector_store %arg8[%c0_17, %c0_18], %20 {strides = array<i32>} : memref<8x10xf32, #tpu.memory_space<vmem>>, vector<8x10xf32>,
    return
  }
  func.func @transform_0(%arg0: i32) -> (i32, i32) {
    %c0_i32 = arith.constant 0 : i32
    %c0_i32_0 = arith.constant 0 : i32
    return %arg0, %c0_i32 : i32, i32
  }
  func.func @transform_1(%arg0: i32) -> (i32, i32) {
    %c0_i32 = arith.constant 0 : i32
    %c0_i32_0 = arith.constant 0 : i32
    %c0_i32_1 = arith.constant 0 : i32
    return %c0_i32, %c0_i32_0 : i32, i32
  }
  func.func @transform_2(%arg0: i32) -> (i32, i32) {
    %c0_i32 = arith.constant 0 : i32
    %c0_i32_0 = arith.constant 0 : i32
    %c0_i32_1 = arith.constant 0 : i32
    return %c0_i32, %c0_i32_0 : i32, i32
  }
  func.func @transform_3(%arg0: i32) -> (i32, i32) {
    %c0_i32 = arith.constant 0 : i32
    %c0_i32_0 = arith.constant 0 : i32
    %c0_i32_1 = arith.constant 0 : i32
    return %c0_i32, %c0_i32_0 : i32, i32
  }
  func.func @transform_4(%arg0: i32) -> (i32, i32) {
    %c0_i32 = arith.constant 0 : i32
    %c0_i32_0 = arith.constant 0 : i32
    %c0_i32_1 = arith.constant 0 : i32
    return %c0_i32, %c0_i32_0 : i32, i32
  }
  func.func @transform_5(%arg0: i32) -> (i32, i32) {
    %c0_i32 = arith.constant 0 : i32
    %c0_i32_0 = arith.constant 0 : i32
    %c0_i32_1 = arith.constant 0 : i32
    return %c0_i32, %c0_i32_0 : i32, i32
  }
  func.func @transform_6(%arg0: i32) -> (i32, i32) {
    %c0_i32 = arith.constant 0 : i32
    %c0_i32_0 = arith.constant 0 : i32
    %c0_i32_1 = arith.constant 0 : i32
    return %c0_i32, %c0_i32_0 : i32, i32
  }
  func.func @transform_7(%arg0: i32) -> (i32, i32) {
    %c0_i32 = arith.constant 0 : i32
    %c0_i32_0 = arith.constant 0 : i32
    return %arg0, %c0_i32 : i32, i32
  }
}

</mosaic_0001>

<bundles_post_ra>
// kernel: tpu_custom_call.1
= control target key start
LH: loop header
LB: loop body
LE: loop exit
PB: predicated region body
PF: predicated region fallthrough
CT: control target
= control target key end

     0   :  { %s1135_s0 = inlined_call_operand.vmem [shape: f32[8,784], index: 0, kind: input, shape index: {}]   ;;  %s1136_s1 = inlined_call_operand.vmem [shape: bf16[784,10], index: 1, kind: input, shape index: {}]   ;;  %s1137_s2 = inlined_call_operand.vmem [shape: f32[1,10], index: 2, kind: input, shape index: {}]   ;;  %s1138_s3 = inlined_call_operand.vmem [shape: f32[10,12], index: 3, kind: input, shape index: {}]   ;;  %s1139_s4 = inlined_call_operand.vmem [shape: f32[1,12], index: 4, kind: input, shape index: {}]   ;;  %s1140_s5 = inlined_call_operand.vmem [shape: f32[12,10], index: 5, kind: input, shape index: {}]   ;;  %s1141_s6 = inlined_call_operand.vmem [shape: f32[1,10], index: 6, kind: input, shape index: {}]   ;;  %s1142_s7 = inlined_call_operand.hbm [shape: f32[8,10], index: 7, kind: output, shape index: {}]  }
   0x1   :  { %v828_v0 = vld [vmem:[%s1136_s1 + $0x38] sm:$0xff]  ;;  %v827_v3 = vld [vmem:[%s1136_s1 + $0x30] sm:$0xff]  ;;  %v826_v8 = vld [vmem:[%s1136_s1 + $0x28] sm:$0xff] }
   0x2   :  { %v836_v1 = vld [vmem:[%s1136_s1 + $0x78] sm:$0xff]  ;;  %442 = vmatpush.bf16.msra.mxu0 %v828_v0  ;;  %v835_v4 = vld [vmem:[%s1136_s1 + $0x70] sm:$0xff]  ;;  %v834_v9 = vld [vmem:[%s1136_s1 + $0x68] sm:$0xff] }
   0x3   :  { %v844_v2 = vld [vmem:[%s1136_s1 + $0xb8] sm:$0xff]  ;;  %455 = vmatpush.bf16.msra.mxu1 %v836_v1  ;;  %v843_v5 = vld [vmem:[%s1136_s1 + $0xb0] sm:$0xff]  ;;  %v842_v10 = vld [vmem:[%s1136_s1 + $0xa8] sm:$0xff] }
   0x4   :  { %468 = vmatpush.bf16.msra.mxu2 %v844_v2  ;;  %v852_v6 = vld [vmem:[%s1136_s1 + $0xf8] sm:$0xff]  ;;  %v851_v7 = vld [vmem:[%s1136_s1 + $0xf0] sm:$0xff]  ;;  %v850_v11 = vld [vmem:[%s1136_s1 + $0xe8] sm:$0xff] }
   0x5   :  { %481 = vmatpush.bf16.msra.mxu3 %v852_v6  ;;  %v825_v12 = vld [vmem:[%s1136_s1 + $0x20] sm:$0xff]  ;;  %v824_v16 = vld [vmem:[%s1136_s1 + $0x18] sm:$0xff] }
   0x6   :  { %443 = vmatpush.bf16.msra.mxu0 %v827_v3  ;;  %v833_v13 = vld [vmem:[%s1136_s1 + $0x60] sm:$0xff]  ;;  %v832_v17 = vld [vmem:[%s1136_s1 + $0x58] sm:$0xff] }
   0x7   :  { %456 = vmatpush.bf16.msra.mxu1 %v835_v4  ;;  %v841_v14 = vld [vmem:[%s1136_s1 + $0xa0] sm:$0xff]  ;;  %v840_v18 = vld [vmem:[%s1136_s1 + $0x98] sm:$0xff] }
   0x8   :  { %469 = vmatpush.bf16.msra.mxu2 %v843_v5  ;;  %v849_v15 = vld [vmem:[%s1136_s1 + $0xe0] sm:$0xff]  ;;  %v848_v19 = vld [vmem:[%s1136_s1 + $0xd8] sm:$0xff] }
   0x9   :  { %482 = vmatpush.bf16.msra.mxu3 %v851_v7 }
   0xa   :  { %444 = vmatpush.bf16.msra.mxu0 %v826_v8 }
   0xb   :  { %457 = vmatpush.bf16.msra.mxu1 %v834_v9 }
   0xc   :  { %470 = vmatpush.bf16.msra.mxu2 %v842_v10 }
   0xd   :  { %483 = vmatpush.bf16.msra.mxu3 %v850_v11 }
   0xe   :  { %445 = vmatpush.bf16.msra.mxu0 %v825_v12 }
   0xf   :  { %458 = vmatpush.bf16.msra.mxu1 %v833_v13 }
  0x10   :  { %471 = vmatpush.bf16.msra.mxu2 %v841_v14 }
  0x11   :  { %484 = vmatpush.bf16.msra.mxu3 %v849_v15 }
  0x12   :  { %12 = vsyncpa [#allocation3], 0  ;;  %446 = vmatpush.bf16.msra.mxu0 %v824_v16  ;;  %v823_v20 = vld [vmem:[%s1136_s1 + $0x10] sm:$0xff]  ;;  %v822_v24 = vld [vmem:[%s1136_s1 + $0x8] sm:$0xff]  ;;  %vm438_vm0 = vcmask 130048   ;;  %vm544_vm1 = vcmask 1041408  }
  0x13   :  { %459 = vmatpush.bf16.msra.mxu1 %v832_v17  ;;  %v831_v21 = vld [vmem:[%s1136_s1 + $0x50] sm:$0xff]  ;;  %v830_v25 = vld [vmem:[%s1136_s1 + $0x48] sm:$0xff]  ;;  %v821_v27 = vld [vmem:[%s1136_s1] sm:$0xff]  ;;  %vm579_vm2 = vcmask 1043456   ;;  %vm540_vm3 = vcmask 80896   ;;  %vm575_vm4 = vcmask 97280  }
  0x14   :  { %472 = vmatpush.bf16.msra.mxu2 %v840_v18  ;;  %v839_v22 = vld [vmem:[%s1136_s1 + $0x90] sm:$0xff]  ;;  %v838_v26 = vld [vmem:[%s1136_s1 + $0x88] sm:$0xff]  ;;  %v829_v29 = vld [vmem:[%s1136_s1 + $0x40] sm:$0xff]  ;;  %s900_s8 = smov [#allocation2]  }
  0x15   :  { %485 = vmatpush.bf16.msra.mxu3 %v848_v19  ;;  %v847_v23 = vld [vmem:[%s1136_s1 + $0xd0] sm:$0xff]  ;;  %v846_v28 = vld [vmem:[%s1136_s1 + $0xc8] sm:$0xff]  ;;  %v28_v30 = vld [vmem:[%s1135_s0] sm:$0xff]  ;;  %s609_s9 = sshll.u32 %s900_s8, 4  ;;  %s610_s9 = int_to_ptr.vmem [resolvable:$true] %s609_s9 }
  0x16   :  { %447 = vmatpush.bf16.msra.mxu0 %v823_v20  ;;  %v29_v31 = vld [vmem:[%s1135_s0 + $0x8] sm:$0xff]  ;;  %v860_v32 = vld [vmem:[%s1136_s1 + $0x138] sm:$0xff]  ;;  %v837_v34 = vld [vmem:[%s1136_s1 + $0x80] sm:$0xff]  ;;  %v35_v36 = vpack.c.bf16 %v28_v30, %v28_v30 }
  0x17   :  { %460 = vmatpush.bf16.msra.mxu1 %v831_v21  ;;  %v868_v33 = vld [vmem:[%s1136_s1 + $0x178] sm:$0xff]  ;;  %v30_v35 = vld [vmem:[%s1135_s0 + $0x10] sm:$0xff]  ;;  %v36_v37 = vpack.c.bf16 %v29_v31, %v29_v31  ;;  %v845_v38 = vld [vmem:[%s1136_s1 + $0xc0] sm:$0xff] }
  0x18   :  { %473 = vmatpush.bf16.msra.mxu2 %v839_v22  ;;  %v869_v39 = vld [vmem:[%s1136_s1 + $0x180] sm:$0xff]  ;;  %v31_v40 = vld [vmem:[%s1135_s0 + $0x18] sm:$0xff]  ;;  %v859_v41 = vld [vmem:[%s1136_s1 + $0x130] sm:$0xff]  ;;  %v37_v43 = vpack.c.bf16 %v30_v35, %v30_v35 }
  0x19   :  { %486 = vmatpush.bf16.msra.mxu3 %v847_v23  ;;  %v867_v42 = vld [vmem:[%s1136_s1 + $0x170] sm:$0xff]  ;;  %v38_v44 = vpack.c.bf16 %v31_v40, %v31_v40  ;;  %v858_v45 = vld [vmem:[%s1136_s1 + $0x128] sm:$0xff]  ;;  %v857_v47 = vld [vmem:[%s1136_s1 + $0x120] sm:$0xff] }
  0x1a   :  { %448 = vmatpush.bf16.msra.mxu0 %v822_v24  ;;  %v866_v46 = vld [vmem:[%s1136_s1 + $0x168] sm:$0xff]  ;;  %v865_v48 = vld [vmem:[%s1136_s1 + $0x160] sm:$0xff]  ;;  %v856_v49 = vld [vmem:[%s1136_s1 + $0x118] sm:$0xff] }
  0x1b   :  { %461 = vmatpush.bf16.msra.mxu1 %v830_v25  ;;  %v864_v50 = vld [vmem:[%s1136_s1 + $0x158] sm:$0xff]  ;;  %v34_v51 = vld [vmem:[%s1135_s0 + $0x30] sm:$0xff]  ;;  %v854_v55 = vld [vmem:[%s1136_s1 + $0x108] sm:$0xff] }
  0x1c   :  { %474 = vmatpush.bf16.msra.mxu2 %v838_v26  ;;  %v855_v52 = vld [vmem:[%s1136_s1 + $0x110] sm:$0xff]  ;;  %v41_v54 = vpack.c.bf16 %v34_v51, %v34_v51  ;;  %v862_v56 = vld [vmem:[%s1136_s1 + $0x148] sm:$0xff]  ;;  %v853_v57 = vld [vmem:[%s1136_s1 + $0x100] sm:$0xff] }
  0x1d   :  { %487 = vmatpush.bf16.msra.mxu3 %v846_v28  ;;  %v863_v53 = vld [vmem:[%s1136_s1 + $0x150] sm:$0xff]  ;;  %v861_v58 = vld [vmem:[%s1136_s1 + $0x140] sm:$0xff]  ;;  %v33_v60 = vld [vmem:[%s1135_s0 + $0x28] sm:$0xff] }
  0x1e   :  { %449 = vmatpush.bf16.msra.mxu0 %v821_v27  ;;  %v32_v59 = vld [vmem:[%s1135_s0 + $0x20] sm:$0xff]  ;;  %v40_v62 = vpack.c.bf16 %v33_v60, %v33_v60  ;;  %v535_v63 = vld [vmem:[%s1138_s3 + $0x8] sm:$0x3] }
  0x1f   :  { %462 = vmatpush.bf16.msra.mxu1 %v829_v29  ;;  %v39_v61 = vpack.c.bf16 %v32_v59, %v32_v59  ;;  %v534_v2 = vld [vmem:[%s1138_s3] sm:$0xff]  ;;  %v570_v3 = vld [vmem:[%s1140_s5 + $0x8] sm:$0xf] }
  0x20   :  { %475 = vmatpush.bf16.msra.mxu2 %v837_v34  ;;  %v871_v8 = vld [vmem:[%s1137_s2] ss:$0 sm:$0xff] }
  0x21   :  { %450 = vmatmul.bf16.vlgmr.msra.gmra.mxu0 %v35_v36  ;;  %488 = vmatpush.bf16.msra.mxu3 %v845_v38  ;;  %v569_v25 = vld [vmem:[%s1140_s5] sm:$0xff]  ;;  %s611_s5 = sshll.u32 %s1142_s7, 4  ;;  %s612_s5 = int_to_ptr.hbm [resolvable:$true] %s611_s5 }
  0x22   :  { %494 = vmatpush.bf16.msrb.mxu0 %v860_v32  ;;  %463 = vmatmul.bf16.vlgmr.msra.gmra.mxu1 %v36_v37  ;;  %v872_v26 = vld [vmem:[%s1139_s4] ss:$0 sm:$0xff] }
  0x23   :  { %507 = vmatpush.bf16.msrb.mxu1 %v868_v33  ;;  %476 = vmatmul.bf16.vlgmr.msra.gmra.mxu2 %v37_v43  ;;  %v873_v30 = vld [vmem:[%s1141_s6] ss:$0 sm:$0xff] }
  0x24   :  { %527 = vmatpush.bf16.msrb.mxu2 %v869_v39  ;;  %489 = vmatmul.bf16.vlgmr.msra.gmra.mxu3 %v38_v44 }
  0x25   :  { %817 = vmatpush.msk.msrb.mxu3 %vm544_vm1, %v535_v63 }
  0x26   :  { %495 = vmatpush.bf16.msrb.mxu0 %v859_v41 }
  0x27   :  { %508 = vmatpush.bf16.msrb.mxu1 %v867_v42  ;;  %563 = vmatpush.msrb.mxu3 %v534_v2 }
  0x29   :  { %819 = vmatpush.msk.msra.mxu3 %vm579_vm2, %v570_v3 }
  0x2a   :  { %496 = vmatpush.bf16.msrb.mxu0 %v858_v45 }
  0x2b   :  { %509 = vmatpush.bf16.msrb.mxu1 %v866_v46  ;;  %598 = vmatpush.msra.mxu3 %v569_v25 }
  0x2e   :  { %497 = vmatpush.bf16.msrb.mxu0 %v857_v47 }
  0x2f   :  { %510 = vmatpush.bf16.msrb.mxu1 %v865_v48 }
  0x32   :  { %498 = vmatpush.bf16.msrb.mxu0 %v856_v49 }
  0x33   :  { %511 = vmatpush.bf16.msrb.mxu1 %v864_v50  ;;  %816 = vmatmul.msk.bf16.vlgmr.msrb.gmra.mxu2 %vm438_vm0, %v41_v54 }
  0x36   :  { %499 = vmatpush.bf16.msrb.mxu0 %v855_v52 }
  0x37   :  { %512 = vmatpush.bf16.msrb.mxu1 %v863_v53 }
  0x3a   :  { %500 = vmatpush.bf16.msrb.mxu0 %v854_v55 }
  0x3b   :  { %513 = vmatpush.bf16.msrb.mxu1 %v862_v56 }
  0x3e   :  { %501 = vmatpush.bf16.msrb.mxu0 %v853_v57 }
  0x3f   :  { %514 = vmatpush.bf16.msrb.mxu1 %v861_v58 }
  0x41   :  { %502 = vmatmul.bf16.vlgmr.msrb.gmra.mxu0 %v39_v61 }
  0x42   :  { %515 = vmatmul.bf16.vlgmr.msrb.gmra.mxu1 %v40_v62 }
  0x9e   :  { %v451_v0 = vpop.f32.mrf.mxu0 }
  0x9f   :  { %v464_v1 = vpop.f32.mrf.mxu1  ;;  %v452_v9 = vadd.f32 %v871_v8, %v451_v0 }
  0xa1   :  { %v465_v12 = vadd.f32 %v464_v1, %v452_v9 }
  0xa6   :  { %v453_v4 = vpop.f32.mrf.mxu0  ;;  %v477_v6 = vpop.f32.mrf.mxu2 }
  0xa7   :  { %v466_v5 = vpop.f32.mrf.mxu1  ;;  %v490_v7 = vpop.f32.mrf.mxu3  ;;  %v478_v13 = vadd.f32 %v477_v6, %v465_v12 }
  0xa9   :  { %v491_v15 = vadd.f32 %v490_v7, %v478_v13 }
  0xae   :  { %v479_v10 = vpop.f32.mrf.mxu2 }
  0xaf   :  { %v492_v11 = vpop.f32.mrf.mxu3 }
  0xb6   :  { %v529_v14 = vpop.f32.mrf.mxu2 }
  0xbe   :  { %v503_v16 = vpop.f32.mrf.mxu0  ;;  %v531_v20 = vpop.f32.mrf.mxu2 }
  0xbf   :  { %v516_v17 = vpop.f32.mrf.mxu1  ;;  %v504_v18 = vadd.f32 %v503_v16, %v491_v15 }
  0xc1   :  { %v517_v19 = vadd.f32 %v516_v17, %v504_v18 }
  0xc3   :  { %v530_v21 = vadd.f32 %v529_v14, %v517_v19 }
  0xc5   :  { %v533_v22 = vmax.f32 %v530_v21, 0.0 }
  0xc6   :  { %v505_v23 = vpop.f32.mrf.mxu0 }
  0xc7   :  { %v518_v24 = vpop.f32.mrf.mxu1  ;;  %818 = vmatmul.msk.f32.vlgmr.msrb.gmra.mxu3 %vm540_vm3, %v533_v22 }
 0x14a   :  { %v565_v27 = vpop.f32.mrf.mxu3 }
 0x14b   :  { %v566_v28 = vadd.f32 %v872_v26, %v565_v27 }
 0x14d   :  { %v568_v29 = vmax.f32 %v566_v28, 0.0 }
 0x14f   :  { %820 = vmatmul.msk.f32.vlgmr.msra.gmra.mxu3 %vm575_vm4, %v568_v29 }
 0x1d2   :  { %v600_v31 = vpop.f32.mrf.mxu3 }
 0x1d3   :  { %v601_v32 = vadd.f32 %v873_v30, %v600_v31 }
 0x1d5   :  { %603 = vst.msk [vmem:[#allocation2] sm:$0xff] %vm540_vm3, %v601_v32 }
 0x1d6   :  { %614 = dma.vmem_to_hbm [thread:$0]  %s610_s9, 128, %s612_s5, [#allocation3]  }
 0x1d7   :  { %898 = dma.done.wait [#allocation3], 128  }
 0x1d8   :  { %899 = vsyncadd [#allocation3], 4294967168 }
 0x1d9   :  { %619 = vsyncpa [#allocation3], 1 }

</bundles_post_ra>
